<compile_context>
chip_gen: v5e
topology: v5e:2x2
jax: 0.10.0
libtpu: 0.0.40
codegen_flags: <defaults>
</compile_context>

<pallas_src>
import functools

import jax
import jax.numpy as jnp
from jax.experimental import pallas as pl
from jax.experimental.pallas import tpu as pltpu

n_embed = 384


def _head_kernel(x_ref, w_ref, o_ref, *, head_size, t_tile, approx_recip):
    # x_ref: (bb, T, C); w_ref: (C, 3H) fused [Wk | Wq*scale | Wv] in MXU dtype;
    # o_ref: (bb, T, H).
    bb, T, C = x_ref.shape
    H = head_size
    mxu_dtype = w_ref.dtype

    # Fold batch into the matmul M dimension: (bb, T, C) -> (bb*T, C).
    x2d = x_ref[...].reshape(bb * T, C)
    if x2d.dtype != mxu_dtype:
        x2d = x2d.astype(mxu_dtype)  # no-op when x arrives pre-cast (preferred)

    # One fused QKV projection on the MXU (f32 accumulation).
    qkv = jnp.dot(x2d, w_ref[...], preferred_element_type=jnp.float32)  # (bb*T, 3H)

    k = qkv[:, 0 * H:1 * H].reshape(bb, T, H).astype(mxu_dtype)
    q = qkv[:, 1 * H:2 * H].reshape(bb, T, H).astype(mxu_dtype)  # scale pre-folded
    v = qkv[:, 2 * H:3 * H].reshape(bb, T, H).astype(mxu_dtype)

    # Causal tiling over rows: rows [t0, t0+tt) attend only to s < t0+tt, so
    # fully-masked upper-triangular score tiles are skipped entirely.
    for it in range(T // t_tile):
        t0 = it * t_tile
        s_len = t0 + t_tile

        k_t = k[:, t0:t0 + t_tile, :]     # (bb, tt, H)
        q_s = q[:, :s_len, :]             # (bb, s_len, H)
        v_s = v[:, :s_len, :]             # (bb, s_len, H)

        # wei[b, t, s] = k[b, t] . q[b, s]   (module computes k @ q^T).
        wei = jnp.einsum("bth,bsh->bts", k_t, q_s,
                         preferred_element_type=jnp.float32)  # (bb, tt, s_len)

        # Causal mask for this tile from 2-D iotas (broadcast over bb). Every
        # row keeps s == t, so the row max below is always finite.
        row = jax.lax.broadcasted_iota(jnp.int32, (t_tile, s_len), 0) + t0
        col = jax.lax.broadcasted_iota(jnp.int32, (t_tile, s_len), 1)
        wei = jnp.where((col <= row)[None, :, :], wei, -jnp.inf)

        # Numerically-stable softmax over s.
        m = jnp.max(wei, axis=-1, keepdims=True)
        p = jnp.exp(wei - m)
        denom = jnp.sum(p, axis=-1, keepdims=True)
        if approx_recip:
            p = p * pl.reciprocal(denom, approx=True)   # EUP slot, ~free
        else:
            p = p / denom                                # exact-parity path

        # TODO(synk): dropout (p=0.2) omitted — eval-mode identity (see header).

        out = jnp.einsum("bts,bsh->bth", p.astype(mxu_dtype), v_s,
                         preferred_element_type=jnp.float32)  # (bb, tt, H) f32
        # TODO(synk): H=32 < 128 lanes -> lane-masked store; real fix is
        # MultiHead-level fusion (lane-dense n_head*H output).
        o_ref[:, t0:t0 + t_tile, :] = out.astype(o_ref.dtype)


def prepare_head_weights(wk, wq, wv, *, mxu_dtype=jnp.bfloat16):
    """Build the fused (C, 3H) QKV weight once, outside the hot path.

    Folds the module's C**-0.5 score scale into the Wq columns and pre-casts to
    the MXU operand dtype (bf16 default; pass jnp.float32 for exact parity).
    """
    scale = wk.shape[0] ** (-0.5)
    w_qkv = jnp.concatenate([wk, wq * scale, wv], axis=1)
    return w_qkv.astype(mxu_dtype)


def _pick_batch_block(B, T, *, target_rows=2048, min_grid_steps=2):
    """Largest divisor bb of B with bb*T <= ~target_rows, while keeping at
    least `min_grid_steps` grid steps when B allows (v7x dual-TC sharding)."""
    cap_rows = max(T, target_rows)
    bb = 1
    for d in range(1, B + 1):
        if B % d:
            continue
        if d * T > cap_rows:
            continue
        if (B // d) < min_grid_steps and B >= min_grid_steps:
            continue
        bb = d
    return bb


def _pick_t_tile(T):
    # 128-row causal tiles when they divide T; otherwise a single tile
    # (no causal skipping — fine for small T, e.g. the demo T=8).
    return 128 if T % 128 == 0 else T


def head_forward(x, w_qkv, *, batch_block=None, approx_recip=None,
                 out_dtype=jnp.float32):
    """x: (B, T, C); w_qkv: (C, 3H) from prepare_head_weights (its dtype is the
    MXU operand dtype). Returns (B, T, H) in out_dtype (f32 by default)."""
    B, T, C = x.shape
    assert w_qkv.shape[0] == C and w_qkv.shape[1] % 3 == 0
    H = w_qkv.shape[1] // 3
    mxu_dtype = w_qkv.dtype
    if approx_recip is None:
        approx_recip = (mxu_dtype != jnp.float32)

    bb = _pick_batch_block(B, T) if batch_block is None else batch_block
    assert B % bb == 0, "batch_block must divide B"
    grid = (B // bb,)
    t_tile = _pick_t_tile(T)

    kernel = functools.partial(
        _head_kernel, head_size=H, t_tile=t_tile, approx_recip=approx_recip)

    # Rough per-step VMEM bytes: double-buffered blocks + live intermediates.
    xb = jnp.dtype(x.dtype).itemsize
    wb = jnp.dtype(mxu_dtype).itemsize
    est = (
        2 * bb * T * C * xb            # x block (double-buffered)
        + 2 * C * 3 * H * wb           # fused weight (double-buffered)
        + 2 * bb * T * H * 4           # output block (double-buffered, f32)
        + bb * T * 3 * H * 4           # qkv (f32)
        + 3 * bb * T * H * wb          # k, q, v (mxu dtype)
        + 2 * bb * t_tile * T * 4      # largest wei + p tile (f32)
    )
    # Cap at 48 MiB: safe on v7x (64 MiB physical VMEM) and far above use.
    vmem_limit = int(min(48 * 1024 * 1024, max(16 * 1024 * 1024, 2 * est)))

    return pl.pallas_call(
        kernel,
        out_shape=jax.ShapeDtypeStruct((B, T, H), out_dtype),
        grid_spec=pltpu.PrefetchScalarGridSpec(
            num_scalar_prefetch=0,
            grid=grid,
            in_specs=[
                pl.BlockSpec((bb, T, C), lambda i: (i, 0, 0)),  # x (batch block)
                pl.BlockSpec((C, 3 * H), lambda i: (0, 0)),     # fused QKV weight
            ],
            out_specs=pl.BlockSpec((bb, T, H), lambda i: (i, 0, 0)),
        ),
        compiler_params=pltpu.CompilerParams(
            dimension_semantics=("parallel",),
            vmem_limit_bytes=vmem_limit,
        ),
    )(x, w_qkv)


def head_reference(x, wk, wq, wv):
    """Pure-JAX f32 reference of the PyTorch forward (dropout in eval mode)."""
    B, T, C = x.shape
    k = x @ wk
    q = x @ wq
    v = x @ wv
    wei = (k @ jnp.swapaxes(q, -2, -1)) * C ** (-0.5)
    tril = jnp.tril(jnp.ones((T, T), dtype=bool))
    wei = jnp.where(tril, wei, -jnp.inf)
    wei = jax.nn.softmax(wei, axis=-1)
    return wei @ v


if __name__ == "__main__":
    # Small shapes consistent with the module: C must equal n_embed (=384).
    B, T, C = 2, 8, n_embed
    head_size = 32

    key = jax.random.PRNGKey(0)
    kx, kk, kq, kv = jax.random.split(key, 4)

    x = jax.random.normal(kx, (B, T, C), dtype=jnp.float32)
    # nn.Linear(n_embed, head_size, bias=False).weight is (head_size, n_embed);
    # we store its transpose (n_embed, head_size) so the forward is x @ W.
    wk = jax.random.normal(kk, (C, head_size), dtype=jnp.float32) * (C ** -0.5)
    wq = jax.random.normal(kq, (C, head_size), dtype=jnp.float32) * (C ** -0.5)
    wv = jax.random.normal(kv, (C, head_size), dtype=jnp.float32) * (C ** -0.5)

    ref = head_reference(x, wk, wq, wv)

    # f32 MXU-operand path: near-exact parity (exact softmax divide).
    w_f32 = prepare_head_weights(wk, wq, wv, mxu_dtype=jnp.float32)
    out_f32 = jax.block_until_ready(head_forward(x, w_f32))
    assert out_f32.shape == (B, T, head_size)
    assert jnp.allclose(out_f32, ref, atol=5e-3, rtol=5e-3), "f32 path mismatch"

    # bf16 MXU-operand path (default; preferred on v6e/v7x). x is cast at the
    # "producer" (here, once outside the kernel); f32 accumulation throughout.
    w_bf16 = prepare_head_weights(wk, wq, wv, mxu_dtype=jnp.bfloat16)
    x_bf16 = x.astype(jnp.bfloat16)
    out_bf16 = jax.block_until_ready(head_forward(x_bf16, w_bf16))
    assert out_bf16.shape == (B, T, head_size)
    assert jnp.allclose(out_bf16, ref, atol=5e-2, rtol=5e-2), "bf16 path mismatch"

    print("KERNEL_OK")
</pallas_src>

<mosaic_0001>
module attributes {stable_mosaic.version = 11 : i64} {
  func.func @_head_kernel(%arg0: i32, %arg1: memref<1x8x384xf32, #tpu.memory_space<vmem>>, %arg2: memref<384x96xf32, #tpu.memory_space<vmem>>, %arg3: memref<1x8x32xf32, #tpu.memory_space<vmem>>) attributes {dimension_semantics = [#tpu.dimension_semantics<parallel>], iteration_bounds = array<i64: 2>, scalar_prefetch = 0 : i64, scratch_operands = 0 : i64, tpu.core_type = #tpu.core_type<tc>, window_params = [{transform_indices = @transform_0, window_bounds = array<i64: 1, 8, 384>}, {pipeline_mode = #tpu.pipeline_mode<synchronous>, transform_indices = @transform_1, window_bounds = array<i64: 384, 96>}, {transform_indices = @transform_2, window_bounds = array<i64: 1, 8, 32>}]} {
    %c0 = arith.constant 0 : index
    %c0_0 = arith.constant 0 : index
    %c0_1 = arith.constant 0 : index
    %0 = vector.load %arg1[%c0, %c0_0, %c0_1] : memref<1x8x384xf32, #tpu.memory_space<vmem>>, vector<1x8x384xf32>
    %1 = vector.shape_cast %0 : vector<1x8x384xf32> to vector<8x384xf32>
    %c0_2 = arith.constant 0 : index
    %c0_3 = arith.constant 0 : index
    %2 = vector.load %arg2[%c0_2, %c0_3] : memref<384x96xf32, #tpu.memory_space<vmem>>, vector<384x96xf32>
    %cst = arith.constant dense<0.000000e+00> : vector<8x96xf32>
    %3 = tpu.matmul %1, %2, %cst {dimension_numbers = #tpu.dot_dimension_numbers<[1], [0], [0], [1], [0, 0, 1, 1], [], []>} : vector<8x384xf32>, vector<384x96xf32>, vector<8x96xf32> -> vector<8x96xf32>
    %4 = vector.extract_strided_slice %3 {offsets = [0, 0], sizes = [8, 32], strides = [1, 1]} : vector<8x96xf32> to vector<8x32xf32>
    %5 = vector.shape_cast %4 : vector<8x32xf32> to vector<1x8x32xf32>
    %6 = vector.extract_strided_slice %3 {offsets = [0, 32], sizes = [8, 32], strides = [1, 1]} : vector<8x96xf32> to vector<8x32xf32>
    %7 = vector.shape_cast %6 : vector<8x32xf32> to vector<1x8x32xf32>
    %8 = vector.extract_strided_slice %3 {offsets = [0, 64], sizes = [8, 32], strides = [1, 1]} : vector<8x96xf32> to vector<8x32xf32>
    %9 = vector.shape_cast %8 : vector<8x32xf32> to vector<1x8x32xf32>
    "tpu.trace_start"() <{level = 10 : i32, message = "bth,bsh->bts"}> : () -> ()
    %cst_4 = arith.constant dense<0.000000e+00> : vector<1x8x8xf32>
    %10 = tpu.matmul %5, %7, %cst_4 {dimension_numbers = #tpu.dot_dimension_numbers<[2], [2], [1], [1], [0, 0, 0, 1, 1, 1], [0], [0]>} : vector<1x8x32xf32>, vector<1x8x32xf32>, vector<1x8x8xf32> -> vector<1x8x8xf32>
    "tpu.trace_stop"() : () -> ()
    %11 = tpu.iota {dimensions = array<i32: 0>} : vector<8x8xi32>
    %c0_i32 = arith.constant 0 : i32
    %12 = vector.broadcast %c0_i32 : i32 to vector<8x8xi32>
    %13 = arith.addi %11, %12 : vector<8x8xi32>
    %14 = tpu.iota {dimensions = array<i32: 1>} : vector<8x8xi32>
    %15 = arith.cmpi sle, %14, %13 : vector<8x8xi32>
    %16 = vector.shape_cast %15 : vector<8x8xi1> to vector<1x8x8xi1>
    %cst_5 = arith.constant 0xFF800000 : f32
    %17 = vector.broadcast %cst_5 : f32 to vector<1x8x8xf32>
    %18 = arith.select %16, %10, %17 : vector<1x8x8xi1>, vector<1x8x8xf32>
    %cst_6 = arith.constant dense<0xFF800000> : vector<1x8xf32>
    %19 = vector.multi_reduction <maximumf>, %18, %cst_6 [2] : vector<1x8x8xf32> to vector<1x8xf32>
    %20 = vector.shape_cast %19 : vector<1x8xf32> to vector<1x8x1xf32>
    %21 = vector.broadcast %20 : vector<1x8x1xf32> to vector<1x8x8xf32>
    %22 = arith.subf %18, %21 : vector<1x8x8xf32>
    %23 = math.exp %22 : vector<1x8x8xf32>
    %cst_7 = arith.constant dense<0.000000e+00> : vector<1x8xf32>
    %24 = vector.multi_reduction <add>, %23, %cst_7 [2] : vector<1x8x8xf32> to vector<1x8xf32>
    %25 = vector.shape_cast %24 : vector<1x8xf32> to vector<1x8x1xf32>
    %26 = vector.broadcast %25 : vector<1x8x1xf32> to vector<1x8x8xf32>
    %27 = arith.divf %23, %26 : vector<1x8x8xf32>
    "tpu.trace_start"() <{level = 10 : i32, message = "bts,bsh->bth"}> : () -> ()
    %cst_8 = arith.constant dense<0.000000e+00> : vector<1x8x32xf32>
    %28 = tpu.matmul %27, %9, %cst_8 {dimension_numbers = #tpu.dot_dimension_numbers<[2], [1], [1], [2], [0, 0, 0, 1, 1, 2], [0], [0]>} : vector<1x8x8xf32>, vector<1x8x32xf32>, vector<1x8x32xf32> -> vector<1x8x32xf32>
    "tpu.trace_stop"() : () -> ()
    %c0_9 = arith.constant 0 : index
    %c0_10 = arith.constant 0 : index
    %c0_11 = arith.constant 0 : index
    %29 = vector.load %arg3[%c0_9, %c0_10, %c0_11] : memref<1x8x32xf32, #tpu.memory_space<vmem>>, vector<1x8x32xf32>
    tpu.vector_store %arg3[%c0_9, %c0_10, %c0_11], %28 {strides = array<i32>} : memref<1x8x32xf32, #tpu.memory_space<vmem>>, vector<1x8x32xf32>,
    return
  }
  func.func @transform_0(%arg0: i32) -> (i32, i32, i32) {
    %c0_i32 = arith.constant 0 : i32
    %c0_i32_0 = arith.constant 0 : i32
    %c0_i32_1 = arith.constant 0 : i32
    return %arg0, %c0_i32, %c0_i32_0 : i32, i32, i32
  }
  func.func @transform_1(%arg0: i32) -> (i32, i32) {
    %c0_i32 = arith.constant 0 : i32
    %c0_i32_0 = arith.constant 0 : i32
    %c0_i32_1 = arith.constant 0 : i32
    return %c0_i32, %c0_i32_0 : i32, i32
  }
  func.func @transform_2(%arg0: i32) -> (i32, i32, i32) {
    %c0_i32 = arith.constant 0 : i32
    %c0_i32_0 = arith.constant 0 : i32
    %c0_i32_1 = arith.constant 0 : i32
    return %arg0, %c0_i32, %c0_i32_0 : i32, i32, i32
  }
}

</mosaic_0001>

<bundles_post_ra>
// kernel: tpu_custom_call.1
= control target key start
LH: loop header
LB: loop body
LE: loop exit
PB: predicated region body
PF: predicated region fallthrough
CT: control target
= control target key end

     0   :  { %7 = vsyncpa [#allocation3], 0  ;;  %s789_s0 = inlined_call_operand.vmem [shape: f32[2,8,384], index: 0, kind: input, shape index: {}]   ;;  %s790_s1 = inlined_call_operand.vmem [shape: f32[384,96], index: 1, kind: input, shape index: {}]   ;;  %s791_s2 = inlined_call_operand.hbm [shape: f32[2,8,32], index: 2, kind: output, shape index: {}]  }
   0x1   :  { %9 = vsyncpa [#allocation3 + $0x1], 0  ;;  %s554_s9 = smov 0   ;;  %s556_s10 = smov 0  }
   0x2   :  { %s558_s11 = smov 0   ;;  %s560_s12 = smov 0  }
   0x3 LB: > { %s575_s13 = sadd.s32 4294967295, %s535_s12   ;;  %s414_s14 = sadd.s32 4294967294, %s535_s12   ;;  %s535_s12 = sphi %s560_s12, %s797_s12   ;;  %s531_s11 = sphi %s558_s11, %s796_s11   ;;  %s527_s10 = sphi %s556_s10, %s795_s10   ;;  %s523_s9 = sphi %s554_s9, %s794_s9  }
   0x4   : > { %s579_s15 = sadd.s32 1, %s535_s12   ;;  %s69_s16 = sadd.s32 1, %s531_s11 }
   0x5   : > { %s66_s17 = ssub.s32 %s535_s12, %s579_s15  ;;  %p79_p0 = scmp.ne.s32.totalorder %s531_s11, %s527_s10 }
   0x6   : > { %p67_p1 = scmp.eq.s32.totalorder %s66_s17, 0  ;;  %p80_p2 = scmp.eq.s32.totalorder %s575_s13, 1 }
   0x7   : > { %p85_p3 = scmp.ne.s32.totalorder %s527_s10, %s523_s9  ;;  %p86_p4 = scmp.eq.s32.totalorder %s414_s14, 1 }
   0x8   : > { %s590_s18 = scalar_select %p67_p1, %s531_s11, %s69_s16  }
   0x9   : > { %p592_p5 = por %p80_p2, %p79_p0  ;;  %p596_p6 = por %p86_p4, %p85_p3 }
   0xa   : > { %p417_p7 = scmp.ge.s32.totalorder %s535_s12, 1  ;;  %p115_p8 = scmp.lt.s32.totalorder %s535_s12, 3 }
   0xc   : > { %p116_p9 = pnand %p417_p7, %p115_p8 }
   0xd   : > { %p137_p10 = scmp.lt.s32.totalorder (!%p116_p9), %s575_s13, 1  ;;  %s537_s27 = smov (!%p116_p9), 96  }
   0xe   : > { %119 = sbr.rel (%p116_p9) target bundleno = 841 (0x349), region = 28  ;;  %s538_s29 = smov (!%p116_p9), 64  }
   0xf   : > { %s134_s30 = sand.u32 (!%p116_p9), 1, %s527_s10   ;;  %s493_s24 = scalar_lea.hbm (!%p116_p9), %s791_s2, 16 }
  0x10   : > { %s418_s3 = sshll.u32 (!%p116_p9), %s134_s30, 3  ;;  %s340_s16 = scalar_lea.sflag (!%p116_p9), [#allocation3], %s134_s30 }
  0x13   : > { %v192_v0 = vld [vmem:[%s790_s1 + $0x178] sm:$0xff]  ;;  %v191_v1 = vld [vmem:[%s790_s1 + $0x170] sm:$0xff]  ;;  %v190_v5 = vld [vmem:[%s790_s1 + $0x168] sm:$0xff]  ;;  %s138_s28 = scalar_select %p137_p10, %s575_s13, 1  ;;  %vm256_vm0 = vcmask 261120   ;;  %v281_v57 = vlaneseq  ;;  %vm287_vm2 = vcmask 64512  }
  0x14   : > { %v160_v2 = vld [vmem:[%s790_s1 + $0x78] sm:$0xff]  ;;  %233 = vmatpush.msra.mxu2 %v192_v0  ;;  %v159_v4 = vld [vmem:[%s790_s1 + $0x70] sm:$0xff]  ;;  %v158_v7 = vld [vmem:[%s790_s1 + $0x68] sm:$0xff] }
  0x15   : > { %193 = vmatpush.msra.mxu0 %v160_v2  ;;  %v176_v3 = vld [vmem:[%s790_s1 + $0xf8] sm:$0xff]  ;;  %v175_v6 = vld [vmem:[%s790_s1 + $0xf0] sm:$0xff]  ;;  %v174_v8 = vld [vmem:[%s790_s1 + $0xe8] sm:$0xff]  ;;  %s427_s22 = smul.u32 24, %s138_s28  ;;  %v282_v58 = vshrl.u32 %v281_v57, 7  ;;  %v284_v59 = vand.u32 127, %v281_v57 }
  0x16   : > { %213 = vmatpush.msra.mxu1 %v176_v3  ;;  %234 = vmatpush.msra.mxu2 %v191_v1  ;;  %v189_v9 = vld [vmem:[%s790_s1 + $0x160] sm:$0xff]  ;;  %v188_v12 = vld [vmem:[%s790_s1 + $0x158] sm:$0xff]  ;;  %v187_v15 = vld [vmem:[%s790_s1 + $0x150] sm:$0xff]  ;;  %s424_s28 = sshll.u32 %s575_s13, 3 }
  0x17   : > { %194 = vmatpush.msra.mxu0 %v159_v4  ;;  %v157_v10 = vld [vmem:[%s790_s1 + $0x60] sm:$0xff]  ;;  %v156_v13 = vld [vmem:[%s790_s1 + $0x58] sm:$0xff]  ;;  %v155_v16 = vld [vmem:[%s790_s1 + $0x50] sm:$0xff]  ;;  %s141_s7 = scalar_lea.vmem %s789_s0, %s427_s22  ;;  %vm285_vm1 = vcmp.le.s32.totalorder %v284_v59, %v282_v58  ;;  %s350_s6 = scalar_lea.hbm %s791_s2, %s424_s28 }
  0x18   : > { %214 = vmatpush.msra.mxu1 %v175_v6  ;;  %235 = vmatpush.msra.mxu2 %v190_v5  ;;  %v173_v11 = vld [vmem:[%s790_s1 + $0xe0] sm:$0xff]  ;;  %v172_v14 = vld [vmem:[%s790_s1 + $0xd8] sm:$0xff]  ;;  %v171_v17 = vld [vmem:[%s790_s1 + $0xd0] sm:$0xff]  ;;  %s354_s14 = sshll.u32 %s350_s6, 4  ;;  %s355_s14 = int_to_ptr.hbm [resolvable:$true] %s354_s14 }
  0x19   : > { %195 = vmatpush.msra.mxu0 %v158_v7  ;;  %v186_v18 = vld [vmem:[%s790_s1 + $0x148] sm:$0xff]  ;;  %v185_v21 = vld [vmem:[%s790_s1 + $0x140] sm:$0xff]  ;;  %v184_v24 = vld [vmem:[%s790_s1 + $0x138] sm:$0xff]  ;;  %s487_s17 = sshra.s32 %s355_s14, 4  ;;  %s488_s17 = int_to_ptr.hbm [resolvable:$true] %s487_s17 }
  0x1a   : > { %215 = vmatpush.msra.mxu1 %v174_v8  ;;  %236 = vmatpush.msra.mxu2 %v189_v9  ;;  %v154_v19 = vld [vmem:[%s790_s1 + $0x48] sm:$0xff]  ;;  %v153_v22 = vld [vmem:[%s790_s1 + $0x40] sm:$0xff]  ;;  %v152_v25 = vld [vmem:[%s790_s1 + $0x38] sm:$0xff]  ;;  %s489_s21 = scalar_lea.hbm %s488_s17, 8  ;;  %p494_p0 = scmp.lt.s32.totalorder %s488_s17, %s791_s2 }
  0x1b   : > { %196 = vmatpush.msra.mxu0 %v157_v10  ;;  %v170_v20 = vld [vmem:[%s790_s1 + $0xc8] sm:$0xff]  ;;  %v169_v23 = vld [vmem:[%s790_s1 + $0xc0] sm:$0xff]  ;;  %v168_v26 = vld [vmem:[%s790_s1 + $0xb8] sm:$0xff]  ;;  %p490_p11 = scmp.ne.s32.totalorder %s488_s17, %s489_s21  ;;  %p495_p1 = scmp.lt.s32.totalorder %s493_s24, %s489_s21 }
  0x1c   : > { %216 = vmatpush.msra.mxu1 %v173_v11  ;;  %237 = vmatpush.msra.mxu2 %v188_v12  ;;  %v183_v27 = vld [vmem:[%s790_s1 + $0x130] sm:$0xff]  ;;  %v182_v30 = vld [vmem:[%s790_s1 + $0x128] sm:$0xff]  ;;  %v181_v33 = vld [vmem:[%s790_s1 + $0x120] sm:$0xff] }
  0x1d   : > { %197 = vmatpush.msra.mxu0 %v156_v13  ;;  %v151_v28 = vld [vmem:[%s790_s1 + $0x30] sm:$0xff]  ;;  %v150_v31 = vld [vmem:[%s790_s1 + $0x28] sm:$0xff]  ;;  %v149_v34 = vld [vmem:[%s790_s1 + $0x20] sm:$0xff]  ;;  %p491_p12 = pnand %p490_p11, %p592_p5  ;;  %p496_p2 = por %p495_p1, %p494_p0 }
  0x1e   : > { %217 = vmatpush.msra.mxu1 %v172_v14  ;;  %238 = vmatpush.msra.mxu2 %v187_v15  ;;  %v167_v29 = vld [vmem:[%s790_s1 + $0xb0] sm:$0xff]  ;;  %v166_v32 = vld [vmem:[%s790_s1 + $0xa8] sm:$0xff]  ;;  %v165_v35 = vld [vmem:[%s790_s1 + $0xa0] sm:$0xff] }
  0x1f   : > { %198 = vmatpush.msra.mxu0 %v155_v16  ;;  %v180_v36 = vld [vmem:[%s790_s1 + $0x118] sm:$0xff]  ;;  %v179_v39 = vld [vmem:[%s790_s1 + $0x110] sm:$0xff]  ;;  %v178_v42 = vld [vmem:[%s790_s1 + $0x108] sm:$0xff]  ;;  %p492_p13 = pneg %p491_p12 }
  0x20   : > { %218 = vmatpush.msra.mxu1 %v171_v17  ;;  %239 = vmatpush.msra.mxu2 %v186_v18  ;;  %v148_v37 = vld [vmem:[%s790_s1 + $0x18] sm:$0xff]  ;;  %v147_v40 = vld [vmem:[%s790_s1 + $0x10] sm:$0xff]  ;;  %v146_v43 = vld [vmem:[%s790_s1 + $0x8] sm:$0xff] }
  0x21   : > { %199 = vmatpush.msra.mxu0 %v154_v19  ;;  %v164_v38 = vld [vmem:[%s790_s1 + $0x98] sm:$0xff]  ;;  %v163_v41 = vld [vmem:[%s790_s1 + $0x90] sm:$0xff]  ;;  %v162_v44 = vld [vmem:[%s790_s1 + $0x88] sm:$0xff]  ;;  %p497_p3 = pnand %p496_p2, %p492_p13 }
  0x22   : > { %219 = vmatpush.msra.mxu1 %v170_v20  ;;  %240 = vmatpush.msra.mxu2 %v185_v21  ;;  %v177_v45 = vld [vmem:[%s790_s1 + $0x100] sm:$0xff]  ;;  %v144_v47 = vld [vmem:[%s141_s7 + $0x10] sm:$0xff]  ;;  %v143_v50 = vld [vmem:[%s141_s7 + $0x8] sm:$0xff] }
  0x23   : > { %200 = vmatpush.msra.mxu0 %v153_v22  ;;  %v145_v46 = vld [vmem:[%s790_s1] sm:$0xff] }
  0x24   : > { %220 = vmatpush.msra.mxu1 %v169_v23  ;;  %241 = vmatpush.msra.mxu2 %v184_v24  ;;  %v161_v48 = vld [vmem:[%s790_s1 + $0x80] sm:$0xff] }
  0x25   : > { %201 = vmatpush.msra.mxu0 %v152_v25  ;;  %v142_v49 = vld [vmem:[%s141_s7] sm:$0xff]  ;;  %s136_s7 = scalar_lea.vmem [#allocation2], %s418_s3 }
  0x26   : > { %221 = vmatpush.msra.mxu1 %v168_v26  ;;  %242 = vmatpush.msra.mxu2 %v183_v27  ;;  %s352_s8 = sshll.u32 %s136_s7, 4  ;;  %s353_s8 = int_to_ptr.vmem [resolvable:$true] %s352_s8 }
  0x27   : > { %202 = vmatpush.msra.mxu0 %v151_v28 }
  0x28   : > { %222 = vmatpush.msra.mxu1 %v167_v29  ;;  %243 = vmatpush.msra.mxu2 %v182_v30 }
  0x29   : > { %203 = vmatpush.msra.mxu0 %v150_v31 }
  0x2a   : > { %223 = vmatpush.msra.mxu1 %v166_v32  ;;  %244 = vmatpush.msra.mxu2 %v181_v33 }
  0x2b   : > { %204 = vmatpush.msra.mxu0 %v149_v34 }
  0x2c   : > { %224 = vmatpush.msra.mxu1 %v165_v35  ;;  %245 = vmatpush.msra.mxu2 %v180_v36 }
  0x2d   : > { %205 = vmatpush.msra.mxu0 %v148_v37 }
  0x2e   : > { %225 = vmatpush.msra.mxu1 %v164_v38  ;;  %246 = vmatpush.msra.mxu2 %v179_v39 }
  0x2f   : > { %206 = vmatpush.msra.mxu0 %v147_v40 }
  0x30   : > { %226 = vmatpush.msra.mxu1 %v163_v41  ;;  %247 = vmatpush.msra.mxu2 %v178_v42 }
  0x31   : > { %207 = vmatpush.msra.mxu0 %v146_v43 }
  0x32   : > { %227 = vmatpush.msra.mxu1 %v162_v44  ;;  %248 = vmatpush.msra.mxu2 %v177_v45 }
  0x33   : > { %208 = vmatpush.msra.mxu0 %v145_v46  ;;  %249 = vmatmul.f32.vlgmr.msra.gmra.mxu2 %v144_v47 }
  0x34   : > { %228 = vmatpush.msra.mxu1 %v161_v48  ;;  %209 = vmatmul.f32.vlgmr.msra.gmra.mxu0 %v142_v49 }
  0x35   : > { %229 = vmatmul.f32.vlgmr.msra.gmra.mxu1 %v143_v50 }
  0xb1   : > { %v210_v51 = vpop.f32.mrf.mxu0 }
  0xb2   : > { %v230_v52 = vpop.f32.mrf.mxu1 }
  0xb3   : > { %v231_v53 = vadd.f32 %v230_v52, %v210_v51 }
  0xb6   : > { %v250_v54 = vpop.f32.mrf.mxu2 }
  0xb7   : > { %v251_v55 = vadd.f32 %v250_v54, %v231_v53 }
  0xb9   : > { %254 = vrot.lane.b32.xlu0 %v251_v55, %s537_s27 }
 0x12b   : > { %v255_v56 = vpop.permute.xlu0 %254 }
 0x12c   : > { %420 = vmatpush.xpose.msk.msra.mxu3 %vm256_vm0, %v255_v56 }
 0x12f   : > { %421 = vmatmul.msk.f32.vlgmr.msra.gmra.mxu3 %vm256_vm0, %v251_v55 }
 0x1b2   : > { %v278_v60 = vpop.f32.mrf.mxu3 }
 0x1b3   : > { %v286_v61 = vsel %vm285_vm1, %v278_v60, -inf }
 0x1b4   : > { %v288_v62 = vsel %vm287_vm2, %v286_v61, -inf }
 0x1b5   : > { %289 = vmax.xlane.f32.xlu0 %v288_v62 }
 0x228   : > { %v290_v63 = vpop.xlane.xlu0 %289 }
 0x229   : > { %v291_v0 = vsub.f32 %v286_v61, %v290_v63 }
 0x22b   : > { %v292_v1 = vmul.f32 1.442695, %v291_v0 }
 0x22d   : > { %469 = vpow2.f32 %v292_v1 }
 0x233   : > { %v470_v2 = vpop.eup %469 }
 0x234   : > { %v294_v3 = vsel %vm287_vm2, %v470_v2, 0.0 }
 0x235   : > { %295 = vadd.xlane.f32.xlu1 %v294_v3 }
 0x24e   : > { %312 = vrot.lane.b32.xlu1 %v251_v55, %s538_s29 }
 0x2a8   : > { %v296_v4 = vpop.xlane.xlu1 %295 }
 0x2a9   : > { %471 = vrcp.f32 %v296_v4  ;;  %v308_v10 = vand.u32 2147483648, %v296_v4  ;;  %vm302_vm4 = vweird.f32 %v296_v4  ;;  %v306_v11 = vand.u32 2147483647, %v296_v4 }
 0x2ab   : > { %v309_v13 = vor.u32 1.1754944e-38, %v308_v10  ;;  %vm307_vm6 = vcmp.eq.f32.partialorder %v306_v11, 8.507059e+37 }
 0x2af   : > { %v472_v5 = vpop.eup %471 }
 0x2b0   : > { %v298_v6 = vmul.f32 %v472_v5, %v296_v4  ;;  %vm303_vm3 = vweird.f32 %v472_v5 }
 0x2b1   : > { %vm304_vm5 = vmor %vm302_vm4, %vm303_vm3 }
 0x2b2   : > { %v299_v7 = vsub.f32 1.0, %v298_v6 }
 0x2b4   : > { %v300_v8 = vmul.f32 %v472_v5, %v299_v7 }
 0x2b6   : > { %v301_v9 = vadd.f32 %v472_v5, %v300_v8 }
 0x2b8   : > { %v305_v12 = vsel %vm304_vm5, %v472_v5, %v301_v9 }
 0x2b9   : > { %v310_v14 = vsel %vm307_vm6, %v309_v13, %v305_v12 }
 0x2ba   : > { %v311_v16 = vmul.f32 %v470_v2, %v310_v14 }
 0x2c0   : > { %v313_v15 = vpop.permute.xlu1 %312 }
 0x2c1   : > { %333 = vmatpush.msrb.mxu3 %v313_v15 }
 0x2c2   : > { %422 = vmatmul.msk.f32.vlgmr.msrb.gmra.mxu3 %vm287_vm2, %v311_v16 }
 0x345   : > { %v335_v17 = vpop.f32.mrf.mxu3 }
 0x346   : > { %338 = vst.msk [vmem:[%s136_s7] sm:$0xff] %vm256_vm0, %v335_v17 }
 0x347   : > { %500 = shalt.err (!%p497_p3)
}
 0x348   : > { %428 = dma.vmem_to_hbm [thread:$0]  (%p592_p5), %s353_s8, 128, %s355_s14, %s340_s16  }
 0x349 PF: > { %p434_p4 = scmp.ge.s32.totalorder %s535_s12, 2  ;;  %s366_s26 = sand.u32 1, %s523_s9  }
 0x34a   : > { %s367_s27 = scalar_lea.sflag [#allocation3], %s366_s26 }
 0x34b   : > { %p431_p7 = pnand %p434_p4, %p596_p6 }
 0x34d   : > { %p432_p8 = pneg %p431_p7 }
 0x34f   : > { %518 = dma.done.wait (%p432_p8), %s367_s27, 128  }
 0x350   : > { %520 = vsyncadd (%p432_p8), %s367_s27, 4294967168  ;;  %p12_p9 = scmp.ge.s32.totalorder %s579_s15, 4   ;;  %s794_s9 = smov %s527_s10 }
 0x351   : > { %s795_s10 = smov %s531_s11  ;;  %s796_s11 = smov %s590_s18 }
 0x352   : > { %s797_s12 = smov %s579_s15  ;;  %14 = sbr.rel (!%p12_p9) target bundleno = 3 (0x3), region = 63 }
 0x357   :  { %373 = vsyncpa [#allocation3], 1 }
 0x358   :  { %375 = vsyncpa [#allocation3 + $0x1], 1 }

</bundles_post_ra>
